<compile_context>
chip_gen: v5e
topology: v5e:2x2
jax: 0.10.0
libtpu: 0.0.40
codegen_flags: <defaults>
</compile_context>

<pallas_src>
import functools

import jax
import jax.numpy as jnp
from jax import lax
from jax.experimental import pallas as pl
from jax.experimental.pallas import tpu as pltpu

SMOOTH = 1e-6
LANE = 128


def _round_up(x, m):
    return ((x + m - 1) // m) * m


def _fold8(x):
    """Fold an (sr, 128) f32 strip down to (8, 128) with <=3 tile-aligned adds."""
    if x.shape[0] == 8:
        return x
    acc = x[0:8]
    for r in range(8, x.shape[0], 8):
        acc = acc + x[r:r + 8]
    return acc


def _choose_tile_rows(C, r_rows, itemsize, mult):
    # ~3 MiB of logits per grid step: big enough to amortize the ~0.35 us per-step
    # pipeline overhead, small enough that the double-buffered footprint
    # (2 x (logits + labels) ~ 8 MiB) fits every generation, including v7x's 64 MiB.
    budget = (3 << 20) // max(1, C * LANE * itemsize)
    budget = max(mult, (budget // mult) * mult)
    full = max(mult, (r_rows // mult) * mult)     # never exceed the array (no oversized blocks)
    return min(budget, full)


def _make_kernel(C, S_total, tr, sr, tiles_per_split):
    n_strips = tr // sr
    nstats = 3 * C + 1

    def kernel(labels_ref, logits_ref, out_ref):
        # labels_ref: (1, tr, 128) int32
        # logits_ref: (1, C, tr, 128) native dtype
        # out_ref:    (1, 1, 3C+1, 8, 128) f32, resident across the innermost grid axis
        j = pl.program_id(1)
        s = pl.program_id(2)

        @pl.when(s == 0)
        def _():
            out_ref[...] = jnp.zeros_like(out_ref)

        # Logical tile index.  For the clamped duplicate tile of an odd split it may
        # point past the last real tile -- then rem0 <= 0 and everything is masked out.
        tile = j * tiles_per_split + s
        rem0 = S_total - tile * (tr * LANE)

        row_ids = lax.broadcasted_iota(jnp.int32, (sr, LANE), 0)
        lane_ids = lax.broadcasted_iota(jnp.int32, (sr, LANE), 1)
        strip_iota = row_ids * LANE + lane_ids             # 0 .. sr*128-1

        def strip(i, accs):
            r0 = pl.multiple_of(i * sr, sr)
            labels = labels_ref[0, pl.ds(r0, sr), :]
            valid_b = strip_iota < (rem0 - i * (sr * LANE))
            valid = valid_b.astype(jnp.float32)

            # Load + cast each class exactly once; everything below is in-register.
            xs = [logits_ref[0, c, pl.ds(r0, sr), :].astype(jnp.float32)
                  for c in range(C)]
            m = xs[0]
            for c in range(1, C):
                m = jnp.maximum(m, xs[c])

            denom = jnp.zeros((sr, LANE), jnp.float32)
            sel = jnp.zeros((sr, LANE), jnp.float32)
            es, mks = [], []
            for c in range(C):
                # Mask BEFORE exp so garbage in padded / OOB rows cannot make inf/NaN.
                x = jnp.where(valid_b, xs[c] - m, 0.0)
                e = jnp.exp(x)
                es.append(e)
                denom = denom + e
                mk = valid_b & (labels == c)                # one-hot mask, reused 3x
                mks.append(mk)
                sel = sel + jnp.where(mk, x, 0.0)

            inv = pl.reciprocal(denom, approx=True)         # EUP slot
            ce = valid * (jnp.log(denom) - sel)             # logsumexp - logit[label]

            out = list(accs)
            out[3 * C] = accs[3 * C] + _fold8(ce)
            for c in range(C):
                p = es[c] * inv
                oneh = mks[c].astype(jnp.float32)
                out[c] = accs[c] + _fold8(oneh)                         # count_c
                out[C + c] = accs[C + c] + _fold8(p * oneh)             # sum p_c @ true class
                out[2 * C + c] = accs[2 * C + c] + _fold8(p * p * valid)  # sum p_c^2
            return tuple(out)

        init = tuple(jnp.zeros((8, LANE), jnp.float32) for _ in range(nstats))
        accs = lax.fori_loop(0, n_strips, strip, init)

        for k in range(nstats):
            out_ref[0, 0, k] += accs[k]

    return kernel


@functools.partial(jax.jit, static_argnames=("tile_rows",))
def dice_ce_loss(y_true, y_pred, *, tile_rows=None):
    """y_true: [B, 1, D, H, W] integer labels; y_pred: [B, C, D, H, W] logits."""
    B, C = y_pred.shape[0], y_pred.shape[1]
    S = y_pred.shape[2] * y_pred.shape[3] * y_pred.shape[4]

    labels = y_true.reshape(B, S).astype(jnp.int32)
    logits = y_pred.reshape(B, C, S)               # keep native dtype; cast in-kernel

    itemsize = jnp.dtype(y_pred.dtype).itemsize
    mult = {1: 32, 2: 16, 4: 8}.get(itemsize, 8)   # sublane packing multiple

    # Only pad when unavoidable (voxel count not lane-aligned, or smaller than one
    # sublane block).  The aligned case is a free reshape -- no HBM copy.  The ragged
    # last row-tile is masked in-kernel instead of padded on the host.
    r_raw = -(-S // LANE)
    r_rows = max(r_raw, mult)
    pad = r_rows * LANE - S
    if pad:
        labels = jnp.pad(labels, ((0, 0), (0, pad)))
        logits = jnp.pad(logits, ((0, 0), (0, 0), (0, pad)))
    labels = labels.reshape(B, r_rows, LANE)
    logits = logits.reshape(B, C, r_rows, LANE)

    if tile_rows is None:
        tr = _choose_tile_rows(C, r_rows, itemsize, mult)
    else:
        tr = min(_round_up(tile_rows, mult), max(mult, (r_rows // mult) * mult))

    num_s = -(-r_rows // tr)                       # ragged last tile handled in-kernel
    n_split = 2 if num_s >= 2 else 1               # engage both TensorCores on v7x
    tps = -(-num_s // n_split)
    nstats = 3 * C + 1

    stats = pl.pallas_call(
        _make_kernel(C, S, tr, mult, tps),
        out_shape=jax.ShapeDtypeStruct((B, n_split, nstats, 8, LANE), jnp.float32),
        grid_spec=pltpu.PrefetchScalarGridSpec(
            num_scalar_prefetch=0,
            grid=(B, n_split, tps),
            in_specs=[
                pl.BlockSpec(
                    (1, tr, LANE),
                    lambda b, j, s: (b, jnp.minimum(j * tps + s, num_s - 1), 0)),
                pl.BlockSpec(
                    (1, C, tr, LANE),
                    lambda b, j, s: (b, 0, jnp.minimum(j * tps + s, num_s - 1), 0)),
            ],
            out_specs=pl.BlockSpec(
                (1, 1, nstats, 8, LANE), lambda b, j, s: (b, j, 0, 0, 0)),
        ),
        compiler_params=pltpu.CompilerParams(
            dimension_semantics=("parallel", "parallel", "arbitrary"),
            # ~8 MiB actual footprint; 32 MiB is safe headroom on v5e/v6e/v7x alike.
            vmem_limit_bytes=32 * 1024 * 1024,
        ),
    )(labels, logits)

    # Tiny epilogue in plain JAX: fold the lane-dense slabs and combine.
    stats = jnp.sum(stats, axis=(1, 3, 4))         # (B, 3C+1)
    count = stats[:, 0:C]
    sptrue = stats[:, C:2 * C]
    sp2 = stats[:, 2 * C:3 * C]
    ce_sum = jnp.sum(stats[:, 3 * C])

    num = count - 2.0 * sptrue + sp2               # sum_s (onehot - p)^2
    den = count + sp2 + SMOOTH                     # sum_s onehot^2 + sum_s p^2 + eps
    dice = jnp.mean(num / den)                     # mean over (b, c)
    ce = ce_sum / float(B * S)                     # mean over all voxels
    return ce + dice


def _reference(y_true, y_pred):
    # Pure-JAX reference mirroring the PyTorch DiceCELoss module.
    C = y_pred.shape[1]
    onehot = jax.nn.one_hot(y_true[:, 0], C, axis=1, dtype=jnp.float32)
    p = jax.nn.softmax(y_pred.astype(jnp.float32), axis=1)
    axes = (2, 3, 4)
    num = jnp.sum(jnp.square(onehot - p), axis=axes)
    den = (jnp.sum(jnp.square(onehot), axis=axes)
           + jnp.sum(jnp.square(p), axis=axes) + SMOOTH)
    dice = jnp.mean(num / den)
    logp = jax.nn.log_softmax(y_pred.astype(jnp.float32), axis=1)
    ce = jnp.mean(-jnp.sum(onehot * logp, axis=1))
    return ce + dice


if __name__ == "__main__":
    key = jax.random.PRNGKey(0)

    # (B, C, D, H, W, logits dtype, forced tile rows)
    cases = [
        (2, 4, 8, 16, 32, jnp.float32, 8),       # multi-tile accumulation + 2-way spatial split
        (1, 3, 5, 7, 9, jnp.float32, None),      # S=315 not lane-aligned -> minimal pad + mask
        (1, 2, 5, 32, 32, jnp.float32, 16),      # ragged last tile + odd tile count under split
        (2, 4, 4, 16, 32, jnp.bfloat16, None),   # packed dtype -> 16-row strips, fold path
    ]
    for i, (B, C, D, H, W, dt, trows) in enumerate(cases):
        k1, k2 = jax.random.split(jax.random.fold_in(key, i))
        y_pred = jax.random.normal(k1, (B, C, D, H, W), dtype=jnp.float32).astype(dt)
        y_true = jax.random.randint(k2, (B, 1, D, H, W), 0, C, dtype=jnp.int32)
        loss = jax.block_until_ready(dice_ce_loss(y_true, y_pred, tile_rows=trows))
        ref = jax.block_until_ready(_reference(y_true, y_pred))
        # Tolerance covers the EUP approximate reciprocal used for the softmax.
        assert jnp.allclose(loss, ref, rtol=5e-3, atol=5e-3), (i, loss, ref)
    print("KERNEL_OK")
</pallas_src>

<mosaic_0001>
module attributes {stable_mosaic.version = 11 : i64} {
  func.func @kernel(%arg0: i32, %arg1: i32, %arg2: i32, %arg3: memref<1x8x128xi32, #tpu.memory_space<vmem>>, %arg4: memref<1x4x8x128xf32, #tpu.memory_space<vmem>>, %arg5: memref<1x1x13x8x128xf32, #tpu.memory_space<vmem>>) attributes {dimension_semantics = [#tpu.dimension_semantics<parallel>, #tpu.dimension_semantics<parallel>, #tpu.dimension_semantics<arbitrary>], iteration_bounds = array<i64: 2, 2, 2>, scalar_prefetch = 0 : i64, scratch_operands = 0 : i64, tpu.core_type = #tpu.core_type<tc>, window_params = [{transform_indices = @transform_0, window_bounds = array<i64: 1, 8, 128>}, {transform_indices = @transform_1, window_bounds = array<i64: 1, 4, 8, 128>}, {transform_indices = @transform_2, window_bounds = array<i64: 1, 1, 13, 8, 128>}]} {
    %c0_i32 = arith.constant 0 : i32
    %0 = arith.cmpi eq, %arg2, %c0_i32 : i32
    %1 = arith.extui %0 : i1 to i32
    %c0_i32_0 = arith.constant 0 : i32
    %2 = arith.cmpi ne, %1, %c0_i32_0 : i32
    scf.if %2 {
      %cst_159 = arith.constant 0.000000e+00 : f32
      %216 = vector.broadcast %cst_159 : f32 to vector<1x1x13x8x128xf32>
      %c0_160 = arith.constant 0 : index
      %c0_161 = arith.constant 0 : index
      %c0_162 = arith.constant 0 : index
      %c0_163 = arith.constant 0 : index
      %c0_164 = arith.constant 0 : index
      %217 = vector.load %arg5[%c0_160, %c0_161, %c0_162, %c0_163, %c0_164] : memref<1x1x13x8x128xf32, #tpu.memory_space<vmem>>, vector<1x1x13x8x128xf32>
      tpu.vector_store %arg5[%c0_160, %c0_161, %c0_162, %c0_163, %c0_164], %216 {strides = array<i32>} : memref<1x1x13x8x128xf32, #tpu.memory_space<vmem>>, vector<1x1x13x8x128xf32>,
    } else {
    }
    %c2_i32 = arith.constant 2 : i32
    %3 = arith.muli %arg1, %c2_i32 : i32
    %4 = arith.addi %3, %arg2 : i32
    %c1024_i32 = arith.constant 1024 : i32
    %5 = arith.muli %4, %c1024_i32 : i32
    %c4096_i32 = arith.constant 4096 : i32
    %6 = arith.subi %c4096_i32, %5 : i32
    %7 = tpu.iota {dimensions = array<i32: 0>} : vector<8x128xi32>
    %8 = tpu.iota {dimensions = array<i32: 1>} : vector<8x128xi32>
    %c128_i32 = arith.constant 128 : i32
    %9 = vector.broadcast %c128_i32 : i32 to vector<8x128xi32>
    %10 = arith.muli %7, %9 : vector<8x128xi32>
    %11 = arith.addi %10, %8 : vector<8x128xi32>
    %cst = arith.constant 0.000000e+00 : f32
    %12 = vector.broadcast %cst : f32 to vector<8x128xf32>
    %cst_1 = arith.constant 0.000000e+00 : f32
    %13 = vector.broadcast %cst_1 : f32 to vector<8x128xf32>
    %cst_2 = arith.constant 0.000000e+00 : f32
    %14 = vector.broadcast %cst_2 : f32 to vector<8x128xf32>
    %cst_3 = arith.constant 0.000000e+00 : f32
    %15 = vector.broadcast %cst_3 : f32 to vector<8x128xf32>
    %cst_4 = arith.constant 0.000000e+00 : f32
    %16 = vector.broadcast %cst_4 : f32 to vector<8x128xf32>
    %cst_5 = arith.constant 0.000000e+00 : f32
    %17 = vector.broadcast %cst_5 : f32 to vector<8x128xf32>
    %cst_6 = arith.constant 0.000000e+00 : f32
    %18 = vector.broadcast %cst_6 : f32 to vector<8x128xf32>
    %cst_7 = arith.constant 0.000000e+00 : f32
    %19 = vector.broadcast %cst_7 : f32 to vector<8x128xf32>
    %cst_8 = arith.constant 0.000000e+00 : f32
    %20 = vector.broadcast %cst_8 : f32 to vector<8x128xf32>
    %cst_9 = arith.constant 0.000000e+00 : f32
    %21 = vector.broadcast %cst_9 : f32 to vector<8x128xf32>
    %cst_10 = arith.constant 0.000000e+00 : f32
    %22 = vector.broadcast %cst_10 : f32 to vector<8x128xf32>
    %cst_11 = arith.constant 0.000000e+00 : f32
    %23 = vector.broadcast %cst_11 : f32 to vector<8x128xf32>
    %cst_12 = arith.constant 0.000000e+00 : f32
    %24 = vector.broadcast %cst_12 : f32 to vector<8x128xf32>
    %c0_i32_13 = arith.constant 0 : i32
    %c8_i32 = arith.constant 8 : i32
    %25 = arith.muli %c0_i32_13, %c8_i32 : i32
    %26 = tpu.assume_multiple %25, 8 : i32
    %c0 = arith.constant 0 : index
    %27 = arith.index_cast %26 : i32 to index
    %c0_14 = arith.constant 0 : index
    %28 = vector.load %arg3[%c0, %27, %c0_14] : memref<1x8x128xi32, #tpu.memory_space<vmem>>, vector<1x8x128xi32>
    %29 = vector.shape_cast %28 : vector<1x8x128xi32> to vector<8x128xi32>
    %c1024_i32_15 = arith.constant 1024 : i32
    %30 = arith.muli %c0_i32_13, %c1024_i32_15 : i32
    %31 = arith.subi %6, %30 : i32
    %32 = vector.broadcast %31 : i32 to vector<8x128xi32>
    %33 = arith.cmpi slt, %11, %32 : vector<8x128xi32>
    %34 = arith.extui %33 : vector<8x128xi1> to vector<8x128xi32>
    %35 = arith.sitofp %34 : vector<8x128xi32> to vector<8x128xf32>
    %c0_16 = arith.constant 0 : index
    %c0_17 = arith.constant 0 : index
    %36 = arith.index_cast %26 : i32 to index
    %c0_18 = arith.constant 0 : index
    %37 = vector.load %arg4[%c0_16, %c0_17, %36, %c0_18] : memref<1x4x8x128xf32, #tpu.memory_space<vmem>>, vector<1x1x8x128xf32>
    %38 = vector.shape_cast %37 : vector<1x1x8x128xf32> to vector<8x128xf32>
    %c0_19 = arith.constant 0 : index
    %c1 = arith.constant 1 : index
    %39 = arith.index_cast %26 : i32 to index
    %c0_20 = arith.constant 0 : index
    %40 = vector.load %arg4[%c0_19, %c1, %39, %c0_20] : memref<1x4x8x128xf32, #tpu.memory_space<vmem>>, vector<1x1x8x128xf32>
    %41 = vector.shape_cast %40 : vector<1x1x8x128xf32> to vector<8x128xf32>
    %c0_21 = arith.constant 0 : index
    %c2 = arith.constant 2 : index
    %42 = arith.index_cast %26 : i32 to index
    %c0_22 = arith.constant 0 : index
    %43 = vector.load %arg4[%c0_21, %c2, %42, %c0_22] : memref<1x4x8x128xf32, #tpu.memory_space<vmem>>, vector<1x1x8x128xf32>
    %44 = vector.shape_cast %43 : vector<1x1x8x128xf32> to vector<8x128xf32>
    %c0_23 = arith.constant 0 : index
    %c3 = arith.constant 3 : index
    %45 = arith.index_cast %26 : i32 to index
    %c0_24 = arith.constant 0 : index
    %46 = vector.load %arg4[%c0_23, %c3, %45, %c0_24] : memref<1x4x8x128xf32, #tpu.memory_space<vmem>>, vector<1x1x8x128xf32>
    %47 = vector.shape_cast %46 : vector<1x1x8x128xf32> to vector<8x128xf32>
    %48 = arith.maximumf %38, %41 : vector<8x128xf32>
    %49 = arith.maximumf %48, %44 : vector<8x128xf32>
    %50 = arith.maximumf %49, %47 : vector<8x128xf32>
    %cst_25 = arith.constant 0.000000e+00 : f32
    %51 = vector.broadcast %cst_25 : f32 to vector<8x128xf32>
    %cst_26 = arith.constant 0.000000e+00 : f32
    %52 = vector.broadcast %cst_26 : f32 to vector<8x128xf32>
    %53 = arith.subf %38, %50 : vector<8x128xf32>
    %cst_27 = arith.constant 0.000000e+00 : f32
    %54 = vector.broadcast %cst_27 : f32 to vector<8x128xf32>
    %55 = arith.select %33, %53, %54 : vector<8x128xi1>, vector<8x128xf32>
    %56 = math.exp %55 : vector<8x128xf32>
    %57 = arith.addf %51, %56 : vector<8x128xf32>
    %c0_i32_28 = arith.constant 0 : i32
    %58 = vector.broadcast %c0_i32_28 : i32 to vector<8x128xi32>
    %59 = arith.cmpi eq, %29, %58 : vector<8x128xi32>
    %60 = arith.andi %33, %59 : vector<8x128xi1>
    %cst_29 = arith.constant 0.000000e+00 : f32
    %61 = vector.broadcast %cst_29 : f32 to vector<8x128xf32>
    %62 = arith.select %60, %55, %61 : vector<8x128xi1>, vector<8x128xf32>
    %63 = arith.addf %52, %62 : vector<8x128xf32>
    %64 = arith.subf %41, %50 : vector<8x128xf32>
    %cst_30 = arith.constant 0.000000e+00 : f32
    %65 = vector.broadcast %cst_30 : f32 to vector<8x128xf32>
    %66 = arith.select %33, %64, %65 : vector<8x128xi1>, vector<8x128xf32>
    %67 = math.exp %66 : vector<8x128xf32>
    %68 = arith.addf %57, %67 : vector<8x128xf32>
    %c1_i32 = arith.constant 1 : i32
    %69 = vector.broadcast %c1_i32 : i32 to vector<8x128xi32>
    %70 = arith.cmpi eq, %29, %69 : vector<8x128xi32>
    %71 = arith.andi %33, %70 : vector<8x128xi1>
    %cst_31 = arith.constant 0.000000e+00 : f32
    %72 = vector.broadcast %cst_31 : f32 to vector<8x128xf32>
    %73 = arith.select %71, %66, %72 : vector<8x128xi1>, vector<8x128xf32>
    %74 = arith.addf %63, %73 : vector<8x128xf32>
    %75 = arith.subf %44, %50 : vector<8x128xf32>
    %cst_32 = arith.constant 0.000000e+00 : f32
    %76 = vector.broadcast %cst_32 : f32 to vector<8x128xf32>
    %77 = arith.select %33, %75, %76 : vector<8x128xi1>, vector<8x128xf32>
    %78 = math.exp %77 : vector<8x128xf32>
    %79 = arith.addf %68, %78 : vector<8x128xf32>
    %c2_i32_33 = arith.constant 2 : i32
    %80 = vector.broadcast %c2_i32_33 : i32 to vector<8x128xi32>
    %81 = arith.cmpi eq, %29, %80 : vector<8x128xi32>
    %82 = arith.andi %33, %81 : vector<8x128xi1>
    %cst_34 = arith.constant 0.000000e+00 : f32
    %83 = vector.broadcast %cst_34 : f32 to vector<8x128xf32>
    %84 = arith.select %82, %77, %83 : vector<8x128xi1>, vector<8x128xf32>
    %85 = arith.addf %74, %84 : vector<8x128xf32>
    %86 = arith.subf %47, %50 : vector<8x128xf32>
    %cst_35 = arith.constant 0.000000e+00 : f32
    %87 = vector.broadcast %cst_35 : f32 to vector<8x128xf32>
    %88 = arith.select %33, %86, %87 : vector<8x128xi1>, vector<8x128xf32>
    %89 = math.exp %88 : vector<8x128xf32>
    %90 = arith.addf %79, %89 : vector<8x128xf32>
    %c3_i32 = arith.constant 3 : i32
    %91 = vector.broadcast %c3_i32 : i32 to vector<8x128xi32>
    %92 = arith.cmpi eq, %29, %91 : vector<8x128xi32>
    %93 = arith.andi %33, %92 : vector<8x128xi1>
    %cst_36 = arith.constant 0.000000e+00 : f32
    %94 = vector.broadcast %cst_36 : f32 to vector<8x128xf32>
    %95 = arith.select %93, %88, %94 : vector<8x128xi1>, vector<8x128xf32>
    %96 = arith.addf %85, %95 : vector<8x128xf32>
    %97 = tpu.reciprocal %90 {approx = true} : vector<8x128xf32> -> vector<8x128xf32>
    %98 = math.log %90 : vector<8x128xf32>
    %99 = arith.subf %98, %96 : vector<8x128xf32>
    %100 = arith.mulf %35, %99 : vector<8x128xf32>
    %101 = arith.addf %24, %100 : vector<8x128xf32>
    %102 = arith.mulf %56, %97 : vector<8x128xf32>
    %103 = arith.extui %60 : vector<8x128xi1> to vector<8x128xi32>
    %104 = arith.sitofp %103 : vector<8x128xi32> to vector<8x128xf32>
    %105 = arith.addf %12, %104 : vector<8x128xf32>
    %106 = arith.mulf %102, %104 : vector<8x128xf32>
    %107 = arith.addf %16, %106 : vector<8x128xf32>
    %108 = arith.mulf %102, %102 : vector<8x128xf32>
    %109 = arith.mulf %108, %35 : vector<8x128xf32>
    %110 = arith.addf %20, %109 : vector<8x128xf32>
    %111 = arith.mulf %67, %97 : vector<8x128xf32>
    %112 = arith.extui %71 : vector<8x128xi1> to vector<8x128xi32>
    %113 = arith.sitofp %112 : vector<8x128xi32> to vector<8x128xf32>
    %114 = arith.addf %13, %113 : vector<8x128xf32>
    %115 = arith.mulf %111, %113 : vector<8x128xf32>
    %116 = arith.addf %17, %115 : vector<8x128xf32>
    %117 = arith.mulf %111, %111 : vector<8x128xf32>
    %118 = arith.mulf %117, %35 : vector<8x128xf32>
    %119 = arith.addf %21, %118 : vector<8x128xf32>
    %120 = arith.mulf %78, %97 : vector<8x128xf32>
    %121 = arith.extui %82 : vector<8x128xi1> to vector<8x128xi32>
    %122 = arith.sitofp %121 : vector<8x128xi32> to vector<8x128xf32>
    %123 = arith.addf %14, %122 : vector<8x128xf32>
    %124 = arith.mulf %120, %122 : vector<8x128xf32>
    %125 = arith.addf %18, %124 : vector<8x128xf32>
    %126 = arith.mulf %120, %120 : vector<8x128xf32>
    %127 = arith.mulf %126, %35 : vector<8x128xf32>
    %128 = arith.addf %22, %127 : vector<8x128xf32>
    %129 = arith.mulf %89, %97 : vector<8x128xf32>
    %130 = arith.extui %93 : vector<8x128xi1> to vector<8x128xi32>
    %131 = arith.sitofp %130 : vector<8x128xi32> to vector<8x128xf32>
    %132 = arith.addf %15, %131 : vector<8x128xf32>
    %133 = arith.mulf %129, %131 : vector<8x128xf32>
    %134 = arith.addf %19, %133 : vector<8x128xf32>
    %135 = arith.mulf %129, %129 : vector<8x128xf32>
    %136 = arith.mulf %135, %35 : vector<8x128xf32>
    %137 = arith.addf %23, %136 : vector<8x128xf32>
    %c1_i32_37 = arith.constant 1 : i32
    %c0_38 = arith.constant 0 : index
    %c0_39 = arith.constant 0 : index
    %c0_40 = arith.constant 0 : index
    %c0_41 = arith.constant 0 : index
    %c0_42 = arith.constant 0 : index
    %138 = vector.load %arg5[%c0_38, %c0_39, %c0_40, %c0_41, %c0_42] : memref<1x1x13x8x128xf32, #tpu.memory_space<vmem>>, vector<1x1x1x8x128xf32>
    %139 = vector.shape_cast %138 : vector<1x1x1x8x128xf32> to vector<8x128xf32>
    %140 = arith.addf %139, %105 : vector<8x128xf32>
    %c0_43 = arith.constant 0 : index
    %c0_44 = arith.constant 0 : index
    %c0_45 = arith.constant 0 : index
    %c0_46 = arith.constant 0 : index
    %c0_47 = arith.constant 0 : index
    %141 = vector.load %arg5[%c0_43, %c0_44, %c0_45, %c0_46, %c0_47] : memref<1x1x13x8x128xf32, #tpu.memory_space<vmem>>, vector<1x1x1x8x128xf32>
    %142 = vector.shape_cast %141 : vector<1x1x1x8x128xf32> to vector<8x128xf32>
    %143 = vector.shape_cast %140 : vector<8x128xf32> to vector<1x1x1x8x128xf32>
    tpu.vector_store %arg5[%c0_43, %c0_44, %c0_45, %c0_46, %c0_47], %143 {strides = array<i32>} : memref<1x1x13x8x128xf32, #tpu.memory_space<vmem>>, vector<1x1x1x8x128xf32>,
    %c0_48 = arith.constant 0 : index
    %c0_49 = arith.constant 0 : index
    %c1_50 = arith.constant 1 : index
    %c0_51 = arith.constant 0 : index
    %c0_52 = arith.constant 0 : index
    %144 = vector.load %arg5[%c0_48, %c0_49, %c1_50, %c0_51, %c0_52] : memref<1x1x13x8x128xf32, #tpu.memory_space<vmem>>, vector<1x1x1x8x128xf32>
    %145 = vector.shape_cast %144 : vector<1x1x1x8x128xf32> to vector<8x128xf32>
    %146 = arith.addf %145, %114 : vector<8x128xf32>
    %c0_53 = arith.constant 0 : index
    %c0_54 = arith.constant 0 : index
    %c1_55 = arith.constant 1 : index
    %c0_56 = arith.constant 0 : index
    %c0_57 = arith.constant 0 : index
    %147 = vector.load %arg5[%c0_53, %c0_54, %c1_55, %c0_56, %c0_57] : memref<1x1x13x8x128xf32, #tpu.memory_space<vmem>>, vector<1x1x1x8x128xf32>
    %148 = vector.shape_cast %147 : vector<1x1x1x8x128xf32> to vector<8x128xf32>
    %149 = vector.shape_cast %146 : vector<8x128xf32> to vector<1x1x1x8x128xf32>
    tpu.vector_store %arg5[%c0_53, %c0_54, %c1_55, %c0_56, %c0_57], %149 {strides = array<i32>} : memref<1x1x13x8x128xf32, #tpu.memory_space<vmem>>, vector<1x1x1x8x128xf32>,
    %c0_58 = arith.constant 0 : index
    %c0_59 = arith.constant 0 : index
    %c2_60 = arith.constant 2 : index
    %c0_61 = arith.constant 0 : index
    %c0_62 = arith.constant 0 : index
    %150 = vector.load %arg5[%c0_58, %c0_59, %c2_60, %c0_61, %c0_62] : memref<1x1x13x8x128xf32, #tpu.memory_space<vmem>>, vector<1x1x1x8x128xf32>
    %151 = vector.shape_cast %150 : vector<1x1x1x8x128xf32> to vector<8x128xf32>
    %152 = arith.addf %151, %123 : vector<8x128xf32>
    %c0_63 = arith.constant 0 : index
    %c0_64 = arith.constant 0 : index
    %c2_65 = arith.constant 2 : index
    %c0_66 = arith.constant 0 : index
    %c0_67 = arith.constant 0 : index
    %153 = vector.load %arg5[%c0_63, %c0_64, %c2_65, %c0_66, %c0_67] : memref<1x1x13x8x128xf32, #tpu.memory_space<vmem>>, vector<1x1x1x8x128xf32>
    %154 = vector.shape_cast %153 : vector<1x1x1x8x128xf32> to vector<8x128xf32>
    %155 = vector.shape_cast %152 : vector<8x128xf32> to vector<1x1x1x8x128xf32>
    tpu.vector_store %arg5[%c0_63, %c0_64, %c2_65, %c0_66, %c0_67], %155 {strides = array<i32>} : memref<1x1x13x8x128xf32, #tpu.memory_space<vmem>>, vector<1x1x1x8x128xf32>,
    %c0_68 = arith.constant 0 : index
    %c0_69 = arith.constant 0 : index
    %c3_70 = arith.constant 3 : index
    %c0_71 = arith.constant 0 : index
    %c0_72 = arith.constant 0 : index
    %156 = vector.load %arg5[%c0_68, %c0_69, %c3_70, %c0_71, %c0_72] : memref<1x1x13x8x128xf32, #tpu.memory_space<vmem>>, vector<1x1x1x8x128xf32>
    %157 = vector.shape_cast %156 : vector<1x1x1x8x128xf32> to vector<8x128xf32>
    %158 = arith.addf %157, %132 : vector<8x128xf32>
    %c0_73 = arith.constant 0 : index
    %c0_74 = arith.constant 0 : index
    %c3_75 = arith.constant 3 : index
    %c0_76 = arith.constant 0 : index
    %c0_77 = arith.constant 0 : index
    %159 = vector.load %arg5[%c0_73, %c0_74, %c3_75, %c0_76, %c0_77] : memref<1x1x13x8x128xf32, #tpu.memory_space<vmem>>, vector<1x1x1x8x128xf32>
    %160 = vector.shape_cast %159 : vector<1x1x1x8x128xf32> to vector<8x128xf32>
    %161 = vector.shape_cast %158 : vector<8x128xf32> to vector<1x1x1x8x128xf32>
    tpu.vector_store %arg5[%c0_73, %c0_74, %c3_75, %c0_76, %c0_77], %161 {strides = array<i32>} : memref<1x1x13x8x128xf32, #tpu.memory_space<vmem>>, vector<1x1x1x8x128xf32>,
    %c0_78 = arith.constant 0 : index
    %c0_79 = arith.constant 0 : index
    %c4 = arith.constant 4 : index
    %c0_80 = arith.constant 0 : index
    %c0_81 = arith.constant 0 : index
    %162 = vector.load %arg5[%c0_78, %c0_79, %c4, %c0_80, %c0_81] : memref<1x1x13x8x128xf32, #tpu.memory_space<vmem>>, vector<1x1x1x8x128xf32>
    %163 = vector.shape_cast %162 : vector<1x1x1x8x128xf32> to vector<8x128xf32>
    %164 = arith.addf %163, %107 : vector<8x128xf32>
    %c0_82 = arith.constant 0 : index
    %c0_83 = arith.constant 0 : index
    %c4_84 = arith.constant 4 : index
    %c0_85 = arith.constant 0 : index
    %c0_86 = arith.constant 0 : index
    %165 = vector.load %arg5[%c0_82, %c0_83, %c4_84, %c0_85, %c0_86] : memref<1x1x13x8x128xf32, #tpu.memory_space<vmem>>, vector<1x1x1x8x128xf32>
    %166 = vector.shape_cast %165 : vector<1x1x1x8x128xf32> to vector<8x128xf32>
    %167 = vector.shape_cast %164 : vector<8x128xf32> to vector<1x1x1x8x128xf32>
    tpu.vector_store %arg5[%c0_82, %c0_83, %c4_84, %c0_85, %c0_86], %167 {strides = array<i32>} : memref<1x1x13x8x128xf32, #tpu.memory_space<vmem>>, vector<1x1x1x8x128xf32>,
    %c0_87 = arith.constant 0 : index
    %c0_88 = arith.constant 0 : index
    %c5 = arith.constant 5 : index
    %c0_89 = arith.constant 0 : index
    %c0_90 = arith.constant 0 : index
    %168 = vector.load %arg5[%c0_87, %c0_88, %c5, %c0_89, %c0_90] : memref<1x1x13x8x128xf32, #tpu.memory_space<vmem>>, vector<1x1x1x8x128xf32>
    %169 = vector.shape_cast %168 : vector<1x1x1x8x128xf32> to vector<8x128xf32>
    %170 = arith.addf %169, %116 : vector<8x128xf32>
    %c0_91 = arith.constant 0 : index
    %c0_92 = arith.constant 0 : index
    %c5_93 = arith.constant 5 : index
    %c0_94 = arith.constant 0 : index
    %c0_95 = arith.constant 0 : index
    %171 = vector.load %arg5[%c0_91, %c0_92, %c5_93, %c0_94, %c0_95] : memref<1x1x13x8x128xf32, #tpu.memory_space<vmem>>, vector<1x1x1x8x128xf32>
    %172 = vector.shape_cast %171 : vector<1x1x1x8x128xf32> to vector<8x128xf32>
    %173 = vector.shape_cast %170 : vector<8x128xf32> to vector<1x1x1x8x128xf32>
    tpu.vector_store %arg5[%c0_91, %c0_92, %c5_93, %c0_94, %c0_95], %173 {strides = array<i32>} : memref<1x1x13x8x128xf32, #tpu.memory_space<vmem>>, vector<1x1x1x8x128xf32>,
    %c0_96 = arith.constant 0 : index
    %c0_97 = arith.constant 0 : index
    %c6 = arith.constant 6 : index
    %c0_98 = arith.constant 0 : index
    %c0_99 = arith.constant 0 : index
    %174 = vector.load %arg5[%c0_96, %c0_97, %c6, %c0_98, %c0_99] : memref<1x1x13x8x128xf32, #tpu.memory_space<vmem>>, vector<1x1x1x8x128xf32>
    %175 = vector.shape_cast %174 : vector<1x1x1x8x128xf32> to vector<8x128xf32>
    %176 = arith.addf %175, %125 : vector<8x128xf32>
    %c0_100 = arith.constant 0 : index
    %c0_101 = arith.constant 0 : index
    %c6_102 = arith.constant 6 : index
    %c0_103 = arith.constant 0 : index
    %c0_104 = arith.constant 0 : index
    %177 = vector.load %arg5[%c0_100, %c0_101, %c6_102, %c0_103, %c0_104] : memref<1x1x13x8x128xf32, #tpu.memory_space<vmem>>, vector<1x1x1x8x128xf32>
    %178 = vector.shape_cast %177 : vector<1x1x1x8x128xf32> to vector<8x128xf32>
    %179 = vector.shape_cast %176 : vector<8x128xf32> to vector<1x1x1x8x128xf32>
    tpu.vector_store %arg5[%c0_100, %c0_101, %c6_102, %c0_103, %c0_104], %179 {strides = array<i32>} : memref<1x1x13x8x128xf32, #tpu.memory_space<vmem>>, vector<1x1x1x8x128xf32>,
    %c0_105 = arith.constant 0 : index
    %c0_106 = arith.constant 0 : index
    %c7 = arith.constant 7 : index
    %c0_107 = arith.constant 0 : index
    %c0_108 = arith.constant 0 : index
    %180 = vector.load %arg5[%c0_105, %c0_106, %c7, %c0_107, %c0_108] : memref<1x1x13x8x128xf32, #tpu.memory_space<vmem>>, vector<1x1x1x8x128xf32>
    %181 = vector.shape_cast %180 : vector<1x1x1x8x128xf32> to vector<8x128xf32>
    %182 = arith.addf %181, %134 : vector<8x128xf32>
    %c0_109 = arith.constant 0 : index
    %c0_110 = arith.constant 0 : index
    %c7_111 = arith.constant 7 : index
    %c0_112 = arith.constant 0 : index
    %c0_113 = arith.constant 0 : index
    %183 = vector.load %arg5[%c0_109, %c0_110, %c7_111, %c0_112, %c0_113] : memref<1x1x13x8x128xf32, #tpu.memory_space<vmem>>, vector<1x1x1x8x128xf32>
    %184 = vector.shape_cast %183 : vector<1x1x1x8x128xf32> to vector<8x128xf32>
    %185 = vector.shape_cast %182 : vector<8x128xf32> to vector<1x1x1x8x128xf32>
    tpu.vector_store %arg5[%c0_109, %c0_110, %c7_111, %c0_112, %c0_113], %185 {strides = array<i32>} : memref<1x1x13x8x128xf32, #tpu.memory_space<vmem>>, vector<1x1x1x8x128xf32>,
    %c0_114 = arith.constant 0 : index
    %c0_115 = arith.constant 0 : index
    %c8 = arith.constant 8 : index
    %c0_116 = arith.constant 0 : index
    %c0_117 = arith.constant 0 : index
    %186 = vector.load %arg5[%c0_114, %c0_115, %c8, %c0_116, %c0_117] : memref<1x1x13x8x128xf32, #tpu.memory_space<vmem>>, vector<1x1x1x8x128xf32>
    %187 = vector.shape_cast %186 : vector<1x1x1x8x128xf32> to vector<8x128xf32>
    %188 = arith.addf %187, %110 : vector<8x128xf32>
    %c0_118 = arith.constant 0 : index
    %c0_119 = arith.constant 0 : index
    %c8_120 = arith.constant 8 : index
    %c0_121 = arith.constant 0 : index
    %c0_122 = arith.constant 0 : index
    %189 = vector.load %arg5[%c0_118, %c0_119, %c8_120, %c0_121, %c0_122] : memref<1x1x13x8x128xf32, #tpu.memory_space<vmem>>, vector<1x1x1x8x128xf32>
    %190 = vector.shape_cast %189 : vector<1x1x1x8x128xf32> to vector<8x128xf32>
    %191 = vector.shape_cast %188 : vector<8x128xf32> to vector<1x1x1x8x128xf32>
    tpu.vector_store %arg5[%c0_118, %c0_119, %c8_120, %c0_121, %c0_122], %191 {strides = array<i32>} : memref<1x1x13x8x128xf32, #tpu.memory_space<vmem>>, vector<1x1x1x8x128xf32>,
    %c0_123 = arith.constant 0 : index
    %c0_124 = arith.constant 0 : index
    %c9 = arith.constant 9 : index
    %c0_125 = arith.constant 0 : index
    %c0_126 = arith.constant 0 : index
    %192 = vector.load %arg5[%c0_123, %c0_124, %c9, %c0_125, %c0_126] : memref<1x1x13x8x128xf32, #tpu.memory_space<vmem>>, vector<1x1x1x8x128xf32>
    %193 = vector.shape_cast %192 : vector<1x1x1x8x128xf32> to vector<8x128xf32>
    %194 = arith.addf %193, %119 : vector<8x128xf32>
    %c0_127 = arith.constant 0 : index
    %c0_128 = arith.constant 0 : index
    %c9_129 = arith.constant 9 : index
    %c0_130 = arith.constant 0 : index
    %c0_131 = arith.constant 0 : index
    %195 = vector.load %arg5[%c0_127, %c0_128, %c9_129, %c0_130, %c0_131] : memref<1x1x13x8x128xf32, #tpu.memory_space<vmem>>, vector<1x1x1x8x128xf32>
    %196 = vector.shape_cast %195 : vector<1x1x1x8x128xf32> to vector<8x128xf32>
    %197 = vector.shape_cast %194 : vector<8x128xf32> to vector<1x1x1x8x128xf32>
    tpu.vector_store %arg5[%c0_127, %c0_128, %c9_129, %c0_130, %c0_131], %197 {strides = array<i32>} : memref<1x1x13x8x128xf32, #tpu.memory_space<vmem>>, vector<1x1x1x8x128xf32>,
    %c0_132 = arith.constant 0 : index
    %c0_133 = arith.constant 0 : index
    %c10 = arith.constant 10 : index
    %c0_134 = arith.constant 0 : index
    %c0_135 = arith.constant 0 : index
    %198 = vector.load %arg5[%c0_132, %c0_133, %c10, %c0_134, %c0_135] : memref<1x1x13x8x128xf32, #tpu.memory_space<vmem>>, vector<1x1x1x8x128xf32>
    %199 = vector.shape_cast %198 : vector<1x1x1x8x128xf32> to vector<8x128xf32>
    %200 = arith.addf %199, %128 : vector<8x128xf32>
    %c0_136 = arith.constant 0 : index
    %c0_137 = arith.constant 0 : index
    %c10_138 = arith.constant 10 : index
    %c0_139 = arith.constant 0 : index
    %c0_140 = arith.constant 0 : index
    %201 = vector.load %arg5[%c0_136, %c0_137, %c10_138, %c0_139, %c0_140] : memref<1x1x13x8x128xf32, #tpu.memory_space<vmem>>, vector<1x1x1x8x128xf32>
    %202 = vector.shape_cast %201 : vector<1x1x1x8x128xf32> to vector<8x128xf32>
    %203 = vector.shape_cast %200 : vector<8x128xf32> to vector<1x1x1x8x128xf32>
    tpu.vector_store %arg5[%c0_136, %c0_137, %c10_138, %c0_139, %c0_140], %203 {strides = array<i32>} : memref<1x1x13x8x128xf32, #tpu.memory_space<vmem>>, vector<1x1x1x8x128xf32>,
    %c0_141 = arith.constant 0 : index
    %c0_142 = arith.constant 0 : index
    %c11 = arith.constant 11 : index
    %c0_143 = arith.constant 0 : index
    %c0_144 = arith.constant 0 : index
    %204 = vector.load %arg5[%c0_141, %c0_142, %c11, %c0_143, %c0_144] : memref<1x1x13x8x128xf32, #tpu.memory_space<vmem>>, vector<1x1x1x8x128xf32>
    %205 = vector.shape_cast %204 : vector<1x1x1x8x128xf32> to vector<8x128xf32>
    %206 = arith.addf %205, %137 : vector<8x128xf32>
    %c0_145 = arith.constant 0 : index
    %c0_146 = arith.constant 0 : index
    %c11_147 = arith.constant 11 : index
    %c0_148 = arith.constant 0 : index
    %c0_149 = arith.constant 0 : index
    %207 = vector.load %arg5[%c0_145, %c0_146, %c11_147, %c0_148, %c0_149] : memref<1x1x13x8x128xf32, #tpu.memory_space<vmem>>, vector<1x1x1x8x128xf32>
    %208 = vector.shape_cast %207 : vector<1x1x1x8x128xf32> to vector<8x128xf32>
    %209 = vector.shape_cast %206 : vector<8x128xf32> to vector<1x1x1x8x128xf32>
    tpu.vector_store %arg5[%c0_145, %c0_146, %c11_147, %c0_148, %c0_149], %209 {strides = array<i32>} : memref<1x1x13x8x128xf32, #tpu.memory_space<vmem>>, vector<1x1x1x8x128xf32>,
    %c0_150 = arith.constant 0 : index
    %c0_151 = arith.constant 0 : index
    %c12 = arith.constant 12 : index
    %c0_152 = arith.constant 0 : index
    %c0_153 = arith.constant 0 : index
    %210 = vector.load %arg5[%c0_150, %c0_151, %c12, %c0_152, %c0_153] : memref<1x1x13x8x128xf32, #tpu.memory_space<vmem>>, vector<1x1x1x8x128xf32>
    %211 = vector.shape_cast %210 : vector<1x1x1x8x128xf32> to vector<8x128xf32>
    %212 = arith.addf %211, %101 : vector<8x128xf32>
    %c0_154 = arith.constant 0 : index
    %c0_155 = arith.constant 0 : index
    %c12_156 = arith.constant 12 : index
    %c0_157 = arith.constant 0 : index
    %c0_158 = arith.constant 0 : index
    %213 = vector.load %arg5[%c0_154, %c0_155, %c12_156, %c0_157, %c0_158] : memref<1x1x13x8x128xf32, #tpu.memory_space<vmem>>, vector<1x1x1x8x128xf32>
    %214 = vector.shape_cast %213 : vector<1x1x1x8x128xf32> to vector<8x128xf32>
    %215 = vector.shape_cast %212 : vector<8x128xf32> to vector<1x1x1x8x128xf32>
    tpu.vector_store %arg5[%c0_154, %c0_155, %c12_156, %c0_157, %c0_158], %215 {strides = array<i32>} : memref<1x1x13x8x128xf32, #tpu.memory_space<vmem>>, vector<1x1x1x8x128xf32>,
    return
  }
  func.func @transform_0(%arg0: i32, %arg1: i32, %arg2: i32) -> (i32, i32, i32) {
    %c2_i32 = arith.constant 2 : i32
    %0 = arith.muli %arg1, %c2_i32 : i32
    %1 = arith.addi %0, %arg2 : i32
    %c3_i32 = arith.constant 3 : i32
    %2 = arith.minsi %1, %c3_i32 : i32
    %c0_i32 = arith.constant 0 : i32
    %c0_i32_0 = arith.constant 0 : i32
    return %arg0, %2, %c0_i32 : i32, i32, i32
  }
  func.func @transform_1(%arg0: i32, %arg1: i32, %arg2: i32) -> (i32, i32, i32, i32) {
    %c2_i32 = arith.constant 2 : i32
    %0 = arith.muli %arg1, %c2_i32 : i32
    %1 = arith.addi %0, %arg2 : i32
    %c3_i32 = arith.constant 3 : i32
    %2 = arith.minsi %1, %c3_i32 : i32
    %c0_i32 = arith.constant 0 : i32
    %c0_i32_0 = arith.constant 0 : i32
    %c0_i32_1 = arith.constant 0 : i32
    return %arg0, %c0_i32, %2, %c0_i32_0 : i32, i32, i32, i32
  }
  func.func @transform_2(%arg0: i32, %arg1: i32, %arg2: i32) -> (i32, i32, i32, i32, i32) {
    %c0_i32 = arith.constant 0 : i32
    %c0_i32_0 = arith.constant 0 : i32
    %c0_i32_1 = arith.constant 0 : i32
    %c0_i32_2 = arith.constant 0 : i32
    return %arg0, %arg1, %c0_i32, %c0_i32_0, %c0_i32_1 : i32, i32, i32, i32, i32
  }
}

</mosaic_0001>

<bundles_post_ra>
// kernel: dice_ce_loss.1
= control target key start
LH: loop header
LB: loop body
LE: loop exit
PB: predicated region body
PF: predicated region fallthrough
CT: control target
= control target key end

     0   :  { %s1053_s0 = inlined_call_operand.vmem [shape: s32[2,32,128], index: 0, kind: input, shape index: {}]   ;;  %s1054_s1 = inlined_call_operand.vmem [shape: f32[2,4,32,128], index: 1, kind: input, shape index: {}]   ;;  %s1055_s2 = inlined_call_operand.vmem [shape: f32[2,2,13,8,128], index: 2, kind: output, shape index: {}]  }
   0x1   :  { %1056 = sst [smem:[#allocation3_spill]] %s1054_s1 }
   0x2   :  { %s829_s9 = smov 0   ;;  %s831_s10 = smov 0  }
   0x3   :  { %s833_s11 = smov 0   ;;  %s835_s12 = smov 0  }
   0x4   :  { %s837_s13 = smov 0   ;;  %s839_s14 = smov 0  }
   0x5   :  { %s841_s15 = smov 0   ;;  %s843_s16 = smov 0  }
   0x6   :  { %s845_s17 = smov 0  }
   0x7 LB: > { %s24_s18 = sadd.s32 1, %s798_s14  ;;  %s27_s19 = sadd.s32 1, %s802_s15  ;;  %s810_s17 = sphi %s845_s17, %s12_s17   ;;  %s806_s16 = sphi %s843_s16, %s1075_s16   ;;  %s802_s15 = sphi %s841_s15, %s1074_s15   ;;  %s798_s14 = sphi %s839_s14, %s1073_s14   ;;  %s794_s13 = sphi %s837_s13, %s1072_s13   ;;  %s790_s12 = sphi %s835_s12, %s1071_s12   ;;  %s786_s11 = sphi %s833_s11, %s1070_s11   ;;  %s782_s10 = sphi %s831_s10, %s1069_s10   ;;  %s778_s9 = sphi %s829_s9, %s1068_s9  }
   0x8   : > { %p25_p0 = scmp.ge.s32.totalorder %s24_s18, 2  ;;  %s598_s20 = sshll.u32 %s802_s15, 1 }
   0x9   : > { %s31_s21 = sadd.s32 1, %s806_s16  ;;  %s72_s22 = sadd.s32 %s798_s14, %s598_s20 }
   0xa   : > { %s1077_s18 = smov (%p25_p0, %s24_s18), 0  ;;  %s1079_s19 = smov (!%p25_p0, %s27_s19), %s802_s15 }
   0xb   : > { %p29_p1 = scmp.ge.s32.totalorder %s1079_s19, 2  ;;  %p73_p2 = scmp.lt.s32.totalorder %s72_s22, 3 }
   0xc   : > { %p91_p3 = scmp.ne.s32.totalorder %s782_s10, %s778_s9  ;;  %p92_p4 = scmp.eq.s32.totalorder %s810_s17, 0 }
   0xd   : > { %s1081_s19 = smov (%p29_p1, %s1079_s19), 0  ;;  %s1083_s21 = smov (!%p29_p1, %s31_s21), %s806_s16 }
   0xe   : > { %s1085_s22 = smov (!%p73_p2, %s72_s22), 3  ;;  %p33_p5 = scmp.ge.s32.totalorder %s1083_s21, 2 }
   0xf   : > { %s599_s23 = sshll.u32 %s1081_s19, 1  ;;  %p93_p6 = por %p92_p4, %p91_p3 }
  0x10   : > { %s76_s24 = sadd.s32 %s599_s23, %s1077_s18  ;;  %s1087_s21 = smov (%p33_p5, %s1083_s21), 0 }
  0x11   : > { %p77_p7 = scmp.lt.s32.totalorder %s76_s24, 3  ;;  %s79_s25 = ssub.s32 %s806_s16, %s1087_s21 }
  0x12   : > { %s84_s28 = sadd.s32 1, %s782_s10  ;;  %p601_p9 = scmp.ge.s32.totalorder %s810_s17, 8 }
  0x13   : > { %s1089_s24 = smov (!%p77_p7, %s76_s24), 3 }
  0x14   : > { %s80_s26 = ssub.s32 %s1085_s22, %s1089_s24  ;;  %145 = sbr.rel (%p601_p9) target bundleno = 39 (0x27), region = 16 }
  0x15   : > { %s81_s27 = sor.u32 %s80_s26, %s79_s25 }
  0x16   : > { %p82_p8 = scmp.eq.s32.totalorder %s81_s27, 0 }
  0x18   : > { %s896_s29 = scalar_select %p82_p8, %s782_s10, %s84_s28  }
  0x19   : > { %167 = sbr.rel (!%p93_p6) target bundleno = 39 (0x27), region = 24  ;;  %s169_s30 = sand.u32 (%p93_p6), 1, %s782_s10  }
  0x1a   : > { %s604_s3 = sshll.u32 (%p93_p6), %s806_s16, 4  ;;  %s602_s4 = sshll.u32 (%p93_p6), %s169_s30, 5 }
  0x1b   : > { %s177_s5 = sadd.s32 (%p93_p6), %s604_s3, %s1085_s22  ;;  %s1057_s1 = sld [smem:[#allocation3_spill]] (%p93_p6) }
  0x1c   : > { %s605_s6 = sshll.u32 (%p93_p6), %s177_s5, 3  ;;  %s171_s23 = scalar_lea.vmem (%p93_p6), [#allocation2], %s602_s4 }
  0x21   : > { %s179_s20 = scalar_lea.vmem %s1057_s1, %s605_s6 }
  0x22   : > { %v214_v0 = vld [vmem:[%s179_s20] sm:$0xff] }
  0x23   : > { %v216_v1 = vld [vmem:[%s179_s20 + $0x20] sm:$0xff]  ;;  %215 = vst [vmem:[%s171_s23] sm:$0xff] %v214_v0 }
  0x24   : > { %v218_v2 = vld [vmem:[%s179_s20 + $0x40] sm:$0xff]  ;;  %217 = vst [vmem:[%s171_s23 + $0x8] sm:$0xff] %v216_v1 }
  0x25   : > { %v220_v3 = vld [vmem:[%s179_s20 + $0x60] sm:$0xff]  ;;  %219 = vst [vmem:[%s171_s23 + $0x10] sm:$0xff] %v218_v2 }
  0x26   : > { %221 = vst [vmem:[%s171_s23 + $0x18] sm:$0xff] %v220_v3 }
  0x27 PF: > { %p606_p10 = scmp.ge.s32.totalorder %s810_s17, 1  ;;  %p226_p11 = scmp.lt.s32.totalorder %s810_s17, 9 }
  0x29   : > { %p227_p12 = pnand %p606_p10, %p226_p11 }
  0x2a   : > { %s233_s22 = sand.u32 (!%p227_p12), 1, %s778_s9   ;;  %s608_s24 = sshll.u32 (!%p227_p12), %s790_s12, 1 }
  0x2b   : > { %230 = sbr.rel (%p227_p12) target bundleno = 120 (0x78), region = 62  ;;  %s607_s25 = sshll.u32 (!%p227_p12), %s233_s22, 5 }
  0x2c   : > { %s909_s26 = sadd.s32 (!%p227_p12), %s786_s11, %s608_s24  ;;  %p274_p0 = scmp.lt.s32.totalorder (!%p227_p12), %s794_s13, 1 }
  0x2d   : > { %p272_p13 = scmp.lt.s32.totalorder (!%p227_p12), %s909_s26, 3  ;;  %p292_p1 = scmp.lt.s32.totalorder (!%p227_p12), %s790_s12, 1 }
  0x2e   : > { %s235_s1 = scalar_lea.vmem (!%p227_p12), [#allocation2], %s607_s25  ;;  %p615_p2 = scmp.ne.s32.totalorder (!%p227_p12), %s786_s11, 0 }
  0x30   : > { %s273_s27 = scalar_select %p272_p13, %s909_s26, 3 }
  0x31   : > { %s1091_s13 = smov (!%p274_p0, %s794_s13), 1  ;;  %s1095_s12 = smov (!%p292_p1, %s790_s12), 1 }
  0x32   : > { %s1093_s27 = smov (!%p272_p13, %s273_s27), 3  ;;  %s612_s28 = sshll.u32 %s1091_s13, 2 }
  0x33   : > { %s279_s30 = sadd.s32 %s612_s28, %s1093_s27  ;;  %s653_s9 = smul.u32 26, %s1091_s13 }
  0x34   : > { %s613_s3 = sshll.u32 %s279_s30, 3  ;;  %s652_s7 = smul.u32 13, %s1095_s12 }
  0x35   : > { %s919_s6 = scalar_lea.vmem %s1053_s0, %s613_s3  ;;  %302 = sbr.rel (%p615_p2) target bundleno = 72 (0x48), region = 70 }
  0x36   : > { %s296_s8 = sadd.s32 %s653_s9, %s652_s7 }
  0x37   : > { %s614_s20 = sshll.u32 %s296_s8, 3 }
  0x38   : > { %s925_s24 = scalar_lea.vmem %s1055_s2, %s614_s20 }
  0x3a   : > { %v812_v4 = vmov 0.0  }
  0x3b   : > { %303 = vst [vmem:[%s925_s24] sm:$0xff] %v812_v4 }
  0x3c   : > { %304 = vst [vmem:[%s925_s24 + $0x8] sm:$0xff] %v812_v4 }
  0x3d   : > { %305 = vst [vmem:[%s925_s24 + $0x10] sm:$0xff] %v812_v4 }
  0x3e   : > { %306 = vst [vmem:[%s925_s24 + $0x18] sm:$0xff] %v812_v4 }
  0x3f   : > { %307 = vst [vmem:[%s925_s24 + $0x20] sm:$0xff] %v812_v4 }
  0x40   : > { %308 = vst [vmem:[%s925_s24 + $0x28] sm:$0xff] %v812_v4 }
  0x41   : > { %309 = vst [vmem:[%s925_s24 + $0x30] sm:$0xff] %v812_v4 }
  0x42   : > { %310 = vst [vmem:[%s925_s24 + $0x38] sm:$0xff] %v812_v4 }
  0x43   : > { %311 = vst [vmem:[%s925_s24 + $0x40] sm:$0xff] %v812_v4 }
  0x44   : > { %312 = vst [vmem:[%s925_s24 + $0x48] sm:$0xff] %v812_v4 }
  0x45   : > { %313 = vst [vmem:[%s925_s24 + $0x50] sm:$0xff] %v812_v4 }
  0x46   : > { %314 = vst [vmem:[%s925_s24 + $0x58] sm:$0xff] %v812_v4 }
  0x47   : > { %315 = vst [vmem:[%s925_s24 + $0x60] sm:$0xff] %v812_v4 }
  0x48 PF: > { %s617_s11 = sshll.u32 %s909_s26, 10  ;;  %v320_v5 = vlaneseq  ;;  %v331_v6 = vld [vmem:[%s235_s1] sm:$0xff]  ;;  %v619_v7 = vld [vmem:[%s235_s1 + $0x8] sm:$0xff]  ;;  %v620_v8 = vld [vmem:[%s235_s1 + $0x10] sm:$0xff]  ;;  %v813_v31 = vmov 0.0  }
  0x49   : > { %v341_v9 = vmax.f32 %v331_v6, %v619_v7  ;;  %s319_s12 = ssub.s32 4096, %s617_s11  ;;  %v621_v12 = vld [vmem:[%s235_s1 + $0x18] sm:$0xff]  ;;  %v326_v13 = vld [vmem:[%s919_s6] sm:$0xff]  ;;  %v626_v28 = vld [vmem:[%s925_s24 + $0x8] sm:$0xff] }
  0x4a   : > { %v321_v10 = vshrl.u32 %v320_v5, 7  ;;  %v323_v11 = vand.u32 127, %v320_v5  ;;  %v327_v16 = vstv %s319_s12  ;;  %vm349_vm0 = vcmp.eq.s32.totalorder %v326_v13, 0  ;;  %v422_v24 = vld [vmem:[%s925_s24] sm:$0xff]  ;;  %v628_v39 = vld [vmem:[%s925_s24 + $0x10] sm:$0xff]  ;;  %v630_v42 = vld [vmem:[%s925_s24 + $0x18] sm:$0xff] }
  0x4b   : > { %v342_v14 = vmax.f32 %v341_v9, %v620_v8  ;;  %vm358_vm1 = vcmp.eq.s32.totalorder %v326_v13, 1  ;;  %vm367_vm3 = vcmp.eq.s32.totalorder %v326_v13, 2  ;;  %vm376_vm5 = vcmp.eq.s32.totalorder %v326_v13, 3  ;;  %v632_v1 = vld [vmem:[%s925_s24 + $0x20] sm:$0xff] }
  0x4c   : > { %v324_v15 = vmul.u32 128, %v321_v10  ;;  %v640_v23 = vld [vmem:[%s925_s24 + $0x40] sm:$0xff] }
  0x4d   : > { %v343_v17 = vmax.f32 %v342_v14, %v621_v12 }
  0x4e   : > { %v325_v18 = vadd.s32 %v324_v15, %v323_v11  ;;  %v648_v34 = vld [vmem:[%s925_s24 + $0x60] sm:$0xff] }
  0x4f   : > { %v344_v19 = vsub.f32 %v331_v6, %v343_v17  ;;  %v353_v20 = vsub.f32 %v619_v7, %v343_v17  ;;  %v362_v21 = vsub.f32 %v620_v8, %v343_v17  ;;  %v371_v22 = vsub.f32 %v621_v12, %v343_v17  ;;  %v634_v6 = vld [vmem:[%s925_s24 + $0x28] sm:$0xff]  ;;  %v636_v7 = vld [vmem:[%s925_s24 + $0x30] sm:$0xff]  ;;  %v638_v8 = vld [vmem:[%s925_s24 + $0x38] sm:$0xff] }
  0x50   : > { %vm943_vm2 = vcmp.lt.s32.totalorder %v325_v18, %v327_v16 }
  0x51   : > { %v345_v25 = vsel %vm943_vm2, %v344_v19, 0.0  ;;  %vm952_vm4 = vmand %vm943_vm2, %vm349_vm0  ;;  %v354_v27 = vsel %vm943_vm2, %v353_v20, 0.0  ;;  %v363_v29 = vsel %vm943_vm2, %v362_v21, 0.0  ;;  %v372_v35 = vsel %vm943_vm2, %v371_v22, 0.0 }
  0x52   : > { %v346_v30 = vmul.f32 1.442695, %v345_v25  ;;  %v622_v32 = vsel %vm952_vm4, 1.0, %v813_v31  ;;  %v355_v33 = vmul.f32 1.442695, %v354_v27  ;;  %vm966_vm6 = vmand %vm943_vm2, %vm358_vm1  ;;  %v351_v55 = vsel %vm952_vm4, %v345_v25, 0.0 }
  0x53   : > { %v423_v36 = vadd.f32 %v622_v32, %v422_v24  ;;  %v623_v37 = vsel %vm966_vm6, 1.0, %v813_v31  ;;  %v364_v38 = vmul.f32 1.442695, %v363_v29  ;;  %vm978_vm7 = vmand %vm943_vm2, %vm367_vm3  ;;  %v373_v44 = vmul.f32 1.442695, %v372_v35  ;;  %v642_v24 = vld [vmem:[%s925_s24 + $0x48] sm:$0xff] }
  0x54   : > { %728 = vpow2.f32 %v346_v30  ;;  %v427_v40 = vadd.f32 %v626_v28, %v623_v37  ;;  %v624_v43 = vsel %vm978_vm7, 1.0, %v813_v31  ;;  %vm989_vm8 = vmand %vm943_vm2, %vm376_vm5  ;;  %v360_v56 = vsel %vm966_vm6, %v354_v27, 0.0  ;;  %v644_v28 = vld [vmem:[%s925_s24 + $0x50] sm:$0xff]  ;;  %v646_v30 = vld [vmem:[%s925_s24 + $0x58] sm:$0xff] }
  0x55   : > { %424 = vst [vmem:[%s925_s24] sm:$0xff] %v423_v36  ;;  %730 = vpow2.f32 %v355_v33  ;;  %v431_v46 = vadd.f32 %v628_v39, %v624_v43  ;;  %v625_v47 = vsel %vm989_vm8, 1.0, %v813_v31  ;;  %v361_v58 = vadd.f32 %v360_v56, %v351_v55 }
  0x56   : > { %627 = vst [vmem:[%s925_s24 + $0x8] sm:$0xff] %v427_v40  ;;  %732 = vpow2.f32 %v364_v38  ;;  %v435_v48 = vadd.f32 %v630_v42, %v625_v47  ;;  %v369_v59 = vsel %vm978_vm7, %v363_v29, 0.0  ;;  %v378_v61 = vsel %vm989_vm8, %v372_v35, 0.0 }
  0x57   : > { %734 = vpow2.f32 %v373_v44  ;;  %629 = vst [vmem:[%s925_s24 + $0x10] sm:$0xff] %v431_v46  ;;  %v370_v60 = vadd.f32 %v369_v59, %v361_v58  ;;  %v618_v9 = vsel %vm943_vm2, 1.0, %v813_v31 }
  0x58   : > { %631 = vst [vmem:[%s925_s24 + $0x18] sm:$0xff] %v435_v48 }
  0x59   : > { %v379_v5 = vadd.f32 %v378_v61, %v370_v60 }
  0x5a   : > { %v729_v49 = vpop.eup %728 }
  0x5b   : > { %v731_v50 = vpop.eup %730 }
  0x5c   : > { %v733_v51 = vpop.eup %732  ;;  %v357_v52 = vadd.f32 %v731_v50, %v729_v49 }
  0x5d   : > { %v735_v53 = vpop.eup %734 }
  0x5e   : > { %v366_v54 = vadd.f32 %v733_v51, %v357_v52 }
  0x60   : > { %v375_v57 = vadd.f32 %v735_v53, %v366_v54 }
  0x62   : > { %736 = vrcp.f32 %v375_v57 }
  0x63   : > { %738 = vlog2.f32 %v375_v57 }
  0x68   : > { %v737_v62 = vpop.eup %736 }
  0x69   : > { %v739_v63 = vpop.eup %738  ;;  %v386_v0 = vmul.f32 %v737_v62, %v729_v49  ;;  %v395_v2 = vmul.f32 %v737_v62, %v731_v50  ;;  %v404_v3 = vmul.f32 %v737_v62, %v733_v51  ;;  %v413_v4 = vmul.f32 %v737_v62, %v735_v53 }
  0x6a   : > { %v382_v10 = vmul.f32 0.6931472, %v739_v63 }
  0x6b   : > { %v390_v11 = vmul.f32 %v622_v32, %v386_v0  ;;  %v399_v12 = vmul.f32 %v623_v37, %v395_v2  ;;  %v408_v13 = vmul.f32 %v624_v43, %v404_v3  ;;  %v417_v14 = vmul.f32 %v625_v47, %v413_v4 }
  0x6c   : > { %v392_v15 = vmul.f32 %v386_v0, %v386_v0  ;;  %v401_v16 = vmul.f32 %v395_v2, %v395_v2  ;;  %v410_v17 = vmul.f32 %v404_v3, %v404_v3  ;;  %v419_v18 = vmul.f32 %v413_v4, %v413_v4 }
  0x6d   : > { %v439_v19 = vadd.f32 %v632_v1, %v390_v11  ;;  %v443_v20 = vadd.f32 %v634_v6, %v399_v12  ;;  %v447_v21 = vadd.f32 %v636_v7, %v408_v13  ;;  %v451_v22 = vadd.f32 %v638_v8, %v417_v14 }
  0x6e   : > { %v393_v25 = vmul.f32 %v618_v9, %v392_v15  ;;  %v402_v26 = vmul.f32 %v618_v9, %v401_v16  ;;  %v411_v27 = vmul.f32 %v618_v9, %v410_v17  ;;  %v420_v29 = vmul.f32 %v618_v9, %v419_v18 }
  0x6f   : > { %633 = vst [vmem:[%s925_s24 + $0x20] sm:$0xff] %v439_v19  ;;  %v383_v31 = vsub.f32 %v382_v10, %v379_v5 }
  0x70   : > { %635 = vst [vmem:[%s925_s24 + $0x28] sm:$0xff] %v443_v20  ;;  %v455_v32 = vadd.f32 %v640_v23, %v393_v25  ;;  %v459_v33 = vadd.f32 %v642_v24, %v402_v26  ;;  %v463_v35 = vadd.f32 %v644_v28, %v411_v27  ;;  %v467_v37 = vadd.f32 %v646_v30, %v420_v29 }
  0x71   : > { %637 = vst [vmem:[%s925_s24 + $0x30] sm:$0xff] %v447_v21  ;;  %v384_v36 = vmul.f32 %v618_v9, %v383_v31 }
  0x72   : > { %639 = vst [vmem:[%s925_s24 + $0x38] sm:$0xff] %v451_v22 }
  0x73   : > { %641 = vst [vmem:[%s925_s24 + $0x40] sm:$0xff] %v455_v32  ;;  %v471_v38 = vadd.f32 %v648_v34, %v384_v36 }
  0x74   : > { %643 = vst [vmem:[%s925_s24 + $0x48] sm:$0xff] %v459_v33 }
  0x75   : > { %645 = vst [vmem:[%s925_s24 + $0x50] sm:$0xff] %v463_v35 }
  0x76   : > { %647 = vst [vmem:[%s925_s24 + $0x58] sm:$0xff] %v467_v37 }
  0x77   : > { %649 = vst [vmem:[%s925_s24 + $0x60] sm:$0xff] %v471_v38 }
  0x78 PF: > { %s12_s17 = sadd.s32 1, %s810_s17   ;;  %s1068_s9 = smov %s782_s10 }
  0x79   : > { %p9_p3 = scmp.ge.s32.totalorder %s12_s17, 10   ;;  %s1069_s10 = smov %s896_s29 }
  0x7a   : > { %s1070_s11 = smov %s798_s14  ;;  %s1071_s12 = smov %s802_s15 }
  0x7b   : > { %s1072_s13 = smov %s806_s16  ;;  %s1073_s14 = smov %s1077_s18 }
  0x7c   : > { %s1074_s15 = smov %s1081_s19  ;;  %s1075_s16 = smov %s1087_s21 }
  0x7d   :  { %11 = sbr.rel (!%p9_p3) target bundleno = 7 (0x7), region = 123 }

</bundles_post_ra>
